<compile_context>
chip_gen: v5e
topology: v5e:2x2
jax: 0.10.0
libtpu: 0.0.40
codegen_flags: <defaults>
</compile_context>

<pallas_src>
import jax
import jax.numpy as jnp
from jax.experimental import pallas as pl
from jax.experimental.pallas import tpu as pltpu


# --------------------------------------------------------------------------
# Kernels
# --------------------------------------------------------------------------
def _attn_body(hb_ref, enc_ref, we_ref, ws_ref, out_ref, mask_ref=None):
    S, TB, H = enc_ref.shape

    # Encoder projection: one flattened (S*TB, H) @ (H, H) bf16 MXU matmul with
    # f32 accumulation.  TB is a multiple of 8 (or the full batch), so the
    # reshape is sublane-preserving.
    enc2d = enc_ref[...].reshape(S * TB, H)                        # bf16
    e_proj = jnp.dot(enc2d, we_ref[...],
                     preferred_element_type=jnp.float32)           # (S*TB, H)

    # Folded hidden projection + bias (precomputed in the wrapper) + tanh (EUP).
    energy = jnp.tanh(e_proj.reshape(S, TB, H) + hb_ref[...][None, :, :])

    # Score projection (output width 1): VPU multiply + lane reduction, not an
    # N=1 MXU matmul.
    scores = jnp.sum(energy * ws_ref[...][None, :, :], axis=-1)    # (S, TB)

    # Transpose only the small score tile (XLU), never the big enc tensor.
    scores = jnp.transpose(scores)                                 # (TB, S)

    if mask_ref is not None:
        # Exact masked_fill_(seq_mask, -1e12) semantics.
        scores = jnp.where(mask_ref[...] > 0.0, jnp.float32(-1e12), scores)

    # Single-pass softmax over the fully resident sequence axis.
    m = jnp.max(scores, axis=-1, keepdims=True)
    p = jnp.exp(scores - m)
    denom = jnp.sum(p, axis=-1, keepdims=True)
    out_ref[...] = p * pl.reciprocal(denom, approx=True)


def _attn_kernel(hb_ref, enc_ref, we_ref, ws_ref, out_ref):
    _attn_body(hb_ref, enc_ref, we_ref, ws_ref, out_ref)


def _attn_kernel_masked(hb_ref, enc_ref, we_ref, ws_ref, mask_ref, out_ref):
    _attn_body(hb_ref, enc_ref, we_ref, ws_ref, out_ref, mask_ref=mask_ref)


# --------------------------------------------------------------------------
# Tiling / VMEM heuristics
# --------------------------------------------------------------------------
def _vmem_limit_bytes():
    """Generation-aware scoped-VMEM limit."""
    try:
        cap = int(pltpu.get_tpu_info().vmem_capacity_bytes)
    except Exception:
        cap = 128 * 1024 * 1024
    if cap <= 64 * 1024 * 1024:            # v7x-class: 64 MiB physical per TC
        return 48 * 1024 * 1024
    return 64 * 1024 * 1024                # v5e / v6e: 128 MiB physical


def _pick_batch_tile(B, S, H, budget_bytes):
    """Largest batch tile whose true per-step footprint fits `budget_bytes`.

    Per batch row we account for:
      * the bf16 enc block, double-buffered             : 2 * S*H*2
      * f32 e_proj / energy intermediates (conservative): 2 * S*H*4
      * hb block (x2 buffers), scores, output block     : small
    Returns (tile, padded_batch).  The tile is a multiple of 8 (sublane rule)
    unless the whole batch fits in one block; when B allows it we keep >= 2
    grid steps so double-buffering and megacore sharding have work to
    overlap / split.
    """
    per_row = 2 * S * H * 2 + 2 * S * H * 4 + 2 * H * 4 + 4 * S * 4
    max_tb = max(1, budget_bytes // per_row)

    if B <= 8:                              # tiny batch: one full-size block
        return B, B
    if max_tb >= B and B <= 16:
        return B, B

    target_steps = 4 if B >= 32 else 2      # aim for a few steps, never 1
    tb = min(max_tb, -(-B // target_steps))
    tb = max(8, (tb // 8) * 8)
    b_pad = -(-B // tb) * tb
    return tb, b_pad


# --------------------------------------------------------------------------
# Wrapper
# --------------------------------------------------------------------------
def attn_forward(hidden, encoder_outputs, w_attn, b_attn, w_score,
                 seq_mask=None, *, batch_tile=None, enc_buffers=2):
    """hidden: (1, B, H); encoder_outputs: (S, B, H); returns (B, 1, S)."""
    S, B, H = encoder_outputs.shape

    # Hoisted hidden projection + bias: one tiny (B, H) @ (H, H) XLA matmul.
    # PyTorch Linear: y = x @ W^T + b, W is (H, 2H), x = cat((hidden, enc)).
    h2d = hidden.reshape(B, H).astype(jnp.float32)
    wh = jnp.transpose(w_attn[:, :H]).astype(jnp.float32)             # (H, H)
    hb = h2d @ wh + b_attn.reshape(1, H).astype(jnp.float32)          # (B, H)

    # Dominant stream in bf16: halves HBM DMA and VMEM residency.  (Ideally
    # the producer already emits bf16 so this cast is a no-op.)
    enc = encoder_outputs.astype(jnp.bfloat16)                        # (S, B, H)
    we = jnp.transpose(w_attn[:, H:]).astype(jnp.bfloat16)            # (H, H)
    ws = w_score.reshape(1, H).astype(jnp.float32)

    vmem_limit = _vmem_limit_bytes()
    fixed = H * H * 2 + 4 * H                                         # We + ws
    if batch_tile is None:
        tb, b_pad = _pick_batch_tile(B, S, H, int(vmem_limit * 0.7) - fixed)
    else:
        tb = batch_tile
        b_pad = -(-B // tb) * tb

    mask_f32 = None
    if seq_mask is not None:
        mask_f32 = seq_mask.astype(jnp.float32)                       # (B, S)

    if b_pad != B:                          # pad batch so tb divides it evenly
        pad = b_pad - B
        hb = jnp.pad(hb, ((0, pad), (0, 0)))
        enc = jnp.pad(enc, ((0, 0), (0, pad), (0, 0)))
        if mask_f32 is not None:
            mask_f32 = jnp.pad(mask_f32, ((0, pad), (0, 0)))

    grid = (b_pad // tb,)

    def _const_spec(shape):
        # Constant-index operands: a second pipeline buffer is pure VMEM waste.
        try:
            return pl.BlockSpec(shape, lambda i: (0,) * len(shape),
                                pipeline_mode=pl.Buffered(1))
        except Exception:
            return pl.BlockSpec(shape, lambda i: (0,) * len(shape))

    if enc_buffers == 2:
        enc_spec = pl.BlockSpec((S, tb, H), lambda i: (0, i, 0))
    else:
        # e.g. enc_buffers=3 on v5e if the trace shows exposed enc DMA.
        enc_spec = pl.BlockSpec((S, tb, H), lambda i: (0, i, 0),
                                pipeline_mode=pl.Buffered(enc_buffers))

    in_specs = [
        pl.BlockSpec((tb, H), lambda i: (i, 0)),       # hb (folded hidden proj)
        enc_spec,                                      # encoder outputs (bf16)
        _const_spec((H, H)),                           # We (bf16, enc half)
        _const_spec((1, H)),                           # score weight row
    ]
    out_spec = pl.BlockSpec((tb, S), lambda i: (i, 0))
    # TODO(synk): for peak MXU / lane-dense-store efficiency the producer
    # should emit H as a multiple of 256 (128 on v5e) and S as a multiple of
    # 128; padding the dominant enc tensor here would double its HBM traffic,
    # so it is left to the caller.
    compiler_params = pltpu.CompilerParams(
        dimension_semantics=("parallel",),             # megacore: shard batch
        vmem_limit_bytes=vmem_limit,
    )

    if mask_f32 is None:
        out = pl.pallas_call(
            _attn_kernel,
            out_shape=jax.ShapeDtypeStruct((b_pad, S), jnp.float32),
            grid=grid,
            in_specs=in_specs,
            out_specs=out_spec,
            compiler_params=compiler_params,
        )(hb, enc, we, ws)
    else:
        out = pl.pallas_call(
            _attn_kernel_masked,
            out_shape=jax.ShapeDtypeStruct((b_pad, S), jnp.float32),
            grid=grid,
            in_specs=in_specs + [pl.BlockSpec((tb, S), lambda i: (i, 0))],
            out_specs=out_spec,
            compiler_params=compiler_params,
        )(hb, enc, we, ws, mask_f32)

    return out[:B, None, :]                            # (B, 1, S)


def attn_reference(hidden, encoder_outputs, w_attn, b_attn, w_score,
                   seq_mask=None):
    """Pure-JAX f32 reference mirroring the PyTorch forward, for validation."""
    S, B, H = encoder_outputs.shape
    h_rep = jnp.tile(hidden, (S, 1, 1))                       # (S, B, H)
    energy_in = jnp.concatenate([h_rep, encoder_outputs], axis=2)
    energy_in = energy_in.reshape(-1, 2 * H)                  # (S*B, 2H)
    e = jnp.tanh(energy_in @ w_attn.T + b_attn)               # (S*B, H)
    scores = (e @ w_score.T)[:, 0]                            # (S*B,)
    scores = scores.reshape(S, B).T                           # (B, S)
    if seq_mask is not None:
        scores = jnp.where(seq_mask, -1e12, scores)
    scores = jax.nn.softmax(scores, axis=1)
    return scores[:, None, :]


if __name__ == "__main__":
    H = 32
    key = jax.random.PRNGKey(0)
    keys = jax.random.split(key, 8)

    # Deterministic params (nn.Linear(2H, H) / nn.Linear(H, 1, bias=False)).
    bound1 = 1.0 / jnp.sqrt(2.0 * H)
    w_attn = jax.random.uniform(keys[0], (H, 2 * H), minval=-bound1,
                                maxval=bound1, dtype=jnp.float32)
    b_attn = jax.random.uniform(keys[1], (H,), minval=-bound1, maxval=bound1,
                                dtype=jnp.float32)
    bound2 = 1.0 / jnp.sqrt(1.0 * H)
    w_score = jax.random.uniform(keys[2], (1, H), minval=-bound2, maxval=bound2,
                                 dtype=jnp.float32)

    # --- Case 1: small batch, unmasked (single full-size block). ---
    B, S = 2, 8
    hidden = jax.random.normal(keys[3], (1, B, H), dtype=jnp.float32)
    enc = jax.random.normal(keys[4], (S, B, H), dtype=jnp.float32)
    out = jax.block_until_ready(
        attn_forward(hidden, enc, w_attn, b_attn, w_score))
    ref = attn_reference(hidden, enc, w_attn, b_attn, w_score)
    assert out.shape == (B, 1, S), out.shape
    assert jnp.allclose(out, ref, atol=2e-2), (
        "unmasked mismatch vs reference: max abs err = "
        f"{float(jnp.max(jnp.abs(out - ref)))}")

    # --- Case 2: small batch, masked. ---
    seq_mask = jax.random.bernoulli(keys[5], 0.3, (B, S))
    out_m = jax.block_until_ready(
        attn_forward(hidden, enc, w_attn, b_attn, w_score, seq_mask=seq_mask))
    ref_m = attn_reference(hidden, enc, w_attn, b_attn, w_score,
                           seq_mask=seq_mask)
    assert jnp.allclose(out_m, ref_m, atol=2e-2), (
        "masked mismatch vs reference: max abs err = "
        f"{float(jnp.max(jnp.abs(out_m - ref_m)))}")

    # --- Case 3: larger batch exercising the padded multi-step grid path. ---
    B2, S2 = 20, 8
    hidden2 = jax.random.normal(keys[6], (1, B2, H), dtype=jnp.float32)
    enc2 = jax.random.normal(keys[7], (S2, B2, H), dtype=jnp.float32)
    seq_mask2 = jax.random.bernoulli(keys[5], 0.3, (B2, S2))
    out2 = jax.block_until_ready(
        attn_forward(hidden2, enc2, w_attn, b_attn, w_score,
                     seq_mask=seq_mask2))
    ref2 = attn_reference(hidden2, enc2, w_attn, b_attn, w_score,
                          seq_mask=seq_mask2)
    assert out2.shape == (B2, 1, S2), out2.shape
    assert jnp.allclose(out2, ref2, atol=2e-2), (
        "padded/multi-step mismatch vs reference: max abs err = "
        f"{float(jnp.max(jnp.abs(out2 - ref2)))}")

    print("KERNEL_OK")
</pallas_src>

<mosaic_0001>
module attributes {stable_mosaic.version = 11 : i64} {
  func.func @_attn_kernel(%arg0: i32, %arg1: memref<2x32xf32, #tpu.memory_space<vmem>>, %arg2: memref<8x2x32xbf16, #tpu.memory_space<vmem>>, %arg3: memref<32x32xbf16, #tpu.memory_space<vmem>>, %arg4: memref<1x32xf32, #tpu.memory_space<vmem>>, %arg5: memref<2x8xf32, #tpu.memory_space<vmem>>) attributes {dimension_semantics = [#tpu.dimension_semantics<parallel>], iteration_bounds = array<i64: 1>, scalar_prefetch = 0 : i64, scratch_operands = 0 : i64, tpu.core_type = #tpu.core_type<tc>, window_params = [{transform_indices = @transform_0, window_bounds = array<i64: 2, 32>}, {transform_indices = @transform_1, window_bounds = array<i64: 8, 2, 32>}, {pipeline_mode = #tpu.pipeline_mode<synchronous>, transform_indices = @transform_2, window_bounds = array<i64: 32, 32>}, {pipeline_mode = #tpu.pipeline_mode<synchronous>, transform_indices = @transform_3, window_bounds = array<i64: 1, 32>}, {transform_indices = @transform_4, window_bounds = array<i64: 2, 8>}]} {
    %c0 = arith.constant 0 : index
    %c0_0 = arith.constant 0 : index
    %c0_1 = arith.constant 0 : index
    %0 = vector.load %arg2[%c0, %c0_0, %c0_1] : memref<8x2x32xbf16, #tpu.memory_space<vmem>>, vector<8x2x32xbf16>
    %1 = vector.shape_cast %0 : vector<8x2x32xbf16> to vector<16x32xbf16>
    %c0_2 = arith.constant 0 : index
    %c0_3 = arith.constant 0 : index
    %2 = vector.load %arg3[%c0_2, %c0_3] : memref<32x32xbf16, #tpu.memory_space<vmem>>, vector<32x32xbf16>
    %cst = arith.constant dense<0.000000e+00> : vector<16x32xf32>
    %3 = tpu.matmul %1, %2, %cst {dimension_numbers = #tpu.dot_dimension_numbers<[1], [0], [0], [1], [0, 0, 1, 1], [], []>} : vector<16x32xbf16>, vector<32x32xbf16>, vector<16x32xf32> -> vector<16x32xf32>
    %4 = vector.shape_cast %3 : vector<16x32xf32> to vector<8x2x32xf32>
    %c0_4 = arith.constant 0 : index
    %c0_5 = arith.constant 0 : index
    %5 = vector.load %arg1[%c0_4, %c0_5] : memref<2x32xf32, #tpu.memory_space<vmem>>, vector<2x32xf32>
    %6 = vector.shape_cast %5 : vector<2x32xf32> to vector<1x2x32xf32>
    %7 = vector.broadcast %6 : vector<1x2x32xf32> to vector<8x2x32xf32>
    %8 = arith.addf %4, %7 : vector<8x2x32xf32>
    %9 = math.tanh %8 : vector<8x2x32xf32>
    %c0_6 = arith.constant 0 : index
    %c0_7 = arith.constant 0 : index
    %10 = vector.load %arg4[%c0_6, %c0_7] : memref<1x32xf32, #tpu.memory_space<vmem>>, vector<1x32xf32>
    %11 = vector.shape_cast %10 : vector<1x32xf32> to vector<1x1x32xf32>
    %12 = vector.broadcast %11 : vector<1x1x32xf32> to vector<8x2x32xf32>
    %13 = arith.mulf %9, %12 : vector<8x2x32xf32>
    %cst_8 = arith.constant dense<0.000000e+00> : vector<8x2xf32>
    %14 = vector.multi_reduction <add>, %13, %cst_8 [2] : vector<8x2x32xf32> to vector<8x2xf32>
    %15 = tpu.transpose %14, [1, 0] : vector<8x2xf32> -> vector<2x8xf32>
    %cst_9 = arith.constant dense<0xFF800000> : vector<2xf32>
    %16 = vector.multi_reduction <maximumf>, %15, %cst_9 [1] : vector<2x8xf32> to vector<2xf32>
    %17 = vector.shape_cast %16 : vector<2xf32> to vector<2x1xf32>
    %18 = vector.broadcast %17 : vector<2x1xf32> to vector<2x8xf32>
    %19 = arith.subf %15, %18 : vector<2x8xf32>
    %20 = math.exp %19 : vector<2x8xf32>
    %cst_10 = arith.constant dense<0.000000e+00> : vector<2xf32>
    %21 = vector.multi_reduction <add>, %20, %cst_10 [1] : vector<2x8xf32> to vector<2xf32>
    %22 = vector.shape_cast %21 : vector<2xf32> to vector<2x1xf32>
    %23 = tpu.reciprocal %22 {approx = true} : vector<2x1xf32> -> vector<2x1xf32>
    %24 = vector.broadcast %23 : vector<2x1xf32> to vector<2x8xf32>
    %25 = arith.mulf %20, %24 : vector<2x8xf32>
    %c0_11 = arith.constant 0 : index
    %c0_12 = arith.constant 0 : index
    %26 = vector.load %arg5[%c0_11, %c0_12] : memref<2x8xf32, #tpu.memory_space<vmem>>, vector<2x8xf32>
    tpu.vector_store %arg5[%c0_11, %c0_12], %25 {strides = array<i32>} : memref<2x8xf32, #tpu.memory_space<vmem>>, vector<2x8xf32>,
    return
  }
  func.func @transform_0(%arg0: i32) -> (i32, i32) {
    %c0_i32 = arith.constant 0 : i32
    %c0_i32_0 = arith.constant 0 : i32
    return %arg0, %c0_i32 : i32, i32
  }
  func.func @transform_1(%arg0: i32) -> (i32, i32, i32) {
    %c0_i32 = arith.constant 0 : i32
    %c0_i32_0 = arith.constant 0 : i32
    %c0_i32_1 = arith.constant 0 : i32
    return %c0_i32, %arg0, %c0_i32_0 : i32, i32, i32
  }
  func.func @transform_2(%arg0: i32) -> (i32, i32) {
    %c0_i32 = arith.constant 0 : i32
    %c0_i32_0 = arith.constant 0 : i32
    %c0_i32_1 = arith.constant 0 : i32
    return %c0_i32, %c0_i32_0 : i32, i32
  }
  func.func @transform_3(%arg0: i32) -> (i32, i32) {
    %c0_i32 = arith.constant 0 : i32
    %c0_i32_0 = arith.constant 0 : i32
    %c0_i32_1 = arith.constant 0 : i32
    return %c0_i32, %c0_i32_0 : i32, i32
  }
  func.func @transform_4(%arg0: i32) -> (i32, i32) {
    %c0_i32 = arith.constant 0 : i32
    %c0_i32_0 = arith.constant 0 : i32
    return %arg0, %c0_i32 : i32, i32
  }
}

</mosaic_0001>

<bundles_post_ra>
// kernel: tpu_custom_call.1
= control target key start
LH: loop header
LB: loop body
LE: loop exit
PB: predicated region body
PF: predicated region fallthrough
CT: control target
= control target key end

     0   :  { %9 = vsyncpa [#allocation3], 0  ;;  %s495_s0 = inlined_call_operand.hbm [shape: f32[2,32], index: 0, kind: input, shape index: {}]   ;;  %s496_s1 = inlined_call_operand.hbm [shape: bf16[8,2,32], index: 1, kind: input, shape index: {}]   ;;  %s497_s2 = inlined_call_operand.hbm [shape: bf16[32,32], index: 2, kind: input, shape index: {}]   ;;  %s498_s3 = inlined_call_operand.vmem [shape: f32[1,32], index: 3, kind: input, shape index: {}]   ;;  %s499_s4 = inlined_call_operand.hbm [shape: f32[2,8], index: 4, kind: output, shape index: {}]  }
   0x1   :  { %10 = vsyncpa [#allocation6], 0  ;;  %s27_s17 = sshll.u32 %s496_s1, 4  ;;  %s28_s17 = int_to_ptr.hbm [resolvable:$true] %s27_s17 }
   0x2   :  { %11 = vsyncpa [#allocation4], 0  ;;  %s436_s18 = smov [#allocation5]   ;;  %s17_s22 = sshll.u32 %s495_s0, 4  ;;  %s18_s22 = int_to_ptr.hbm [resolvable:$true] %s17_s22 }
   0x3   :  { %s29_s19 = sshll.u32 %s436_s18, 4  ;;  %s437_s23 = smov 16   ;;  %s30_s19 = int_to_ptr.vmem [resolvable:$true] %s29_s19 }
   0x4   :  { %s438_s24 = smov 1   ;;  %s439_s25 = smov [#allocation2]  }
   0x5   :  { %35 = dma.hbm_to_vmem [thread:$0]  %s28_s17, 128, %s30_s19, [#allocation6], %s437_s23, %s437_s23, %s438_s24  }
   0x6   :  { %s19_s26 = sshll.u32 %s439_s25, 4  ;;  %s40_s29 = sshll.u32 %s497_s2, 4  ;;  %s20_s26 = int_to_ptr.vmem [resolvable:$true] %s19_s26  ;;  %s41_s29 = int_to_ptr.hbm [resolvable:$true] %s40_s29 }
   0x7   :  { %22 = dma.hbm_to_vmem [thread:$0]  %s18_s22, 32, %s20_s26, [#allocation3]  }
   0x8   :  { %s440_s1 = smov [#allocation7]   ;;  %s441_s5 = smov 64  }
   0x9   :  { %s42_s30 = sshll.u32 %s440_s1, 4  ;;  %s442_s6 = smov 4   ;;  %s43_s30 = int_to_ptr.vmem [resolvable:$true] %s42_s30 }
   0xa   :  { %48 = dma.hbm_to_vmem [thread:$0]  %s41_s29, 256, %s43_s30, [#allocation6], %s441_s5, %s441_s5, %s442_s6  }
   0xb   :  { %430 = dma.done.wait [#allocation3], 32  }
   0xc   :  { %431 = vsyncadd [#allocation3], 4294967264 }
   0xd   :  { %432 = dma.done.wait [#allocation6], 384  }
   0xe   :  { %433 = vsyncadd [#allocation6], 4294966912  ;;  %v303_v0 = vld [vmem:[#allocation7 + $0x8] sm:$0xff]  ;;  %v64_v1 = vld [vmem:[#allocation5] sm:$0x1]  ;;  %vm112_vm0 = vcmask 261120   ;;  %v205_v54 = vlaneseq }
   0xf   :  { %v65_v2 = vld [vmem:[#allocation5 + $0x1] sm:$0x1]  ;;  %121 = vmatpush.bf16.msra.mxu0 %v303_v0  ;;  %v302_v3 = vld [vmem:[#allocation7] sm:$0xff]  ;;  %v66_v4 = vld [vmem:[#allocation5 + $0x2] sm:$0x1]  ;;  %vm172_vm1 = vcmask 254976  }
  0x10   :  { %v67_v5 = vld [vmem:[#allocation5 + $0x3] sm:$0x1]  ;;  %77 = vst [vmem:[#allocation1] ss:$9 sm:$0xff] %v64_v1  ;;  %v68_v6 = vld [vmem:[#allocation5 + $0x4] sm:$0x1] }
  0x11   :  { %80 = vst [vmem:[#allocation1 + $0x1] ss:$9 sm:$0xff] %v65_v2  ;;  %v69_v7 = vld [vmem:[#allocation5 + $0x5] sm:$0x1]  ;;  %v70_v8 = vld [vmem:[#allocation5 + $0x6] sm:$0x1] }
  0x12   :  { %83 = vst [vmem:[#allocation1 + $0x2] ss:$9 sm:$0xff] %v66_v4  ;;  %v71_v9 = vld [vmem:[#allocation5 + $0x7] sm:$0x1]  ;;  %v143_v11 = vld [vmem:[#allocation2] sm:$0x3] }
  0x13   :  { %122 = vmatpush.bf16.msra.mxu0 %v302_v3  ;;  %86 = vst [vmem:[#allocation1 + $0x3] ss:$9 sm:$0xff] %v67_v5  ;;  %v313_v20 = vld [vmem:[%s498_s3] ss:$0 sm:$0xff]  ;;  %v206_v56 = vand.u32 127, %v205_v54  ;;  %vm215_vm2 = vcmask 1041409  }
  0x14   :  { %89 = vst [vmem:[#allocation1 + $0x4] ss:$9 sm:$0xff] %v68_v6  ;;  %vm217_vm3 = vcmask 1042434   ;;  %vm219_vm4 = vcmask 1043459   ;;  %vm221_vm5 = vcmask 1044484   ;;  %vm223_vm6 = vcmask 1045509  }
  0x15   :  { %92 = vst [vmem:[#allocation1 + $0x5] ss:$9 sm:$0xff] %v69_v7  ;;  %vm225_vm7 = vcmask 1046534   ;;  %vm227_vm8 = vcmask 1047559   ;;  %vm262_vm9 = vcmask 58368   ;;  %s443_s3 = smov [#allocation8]  }
  0x16   :  { %95 = vst [vmem:[#allocation1 + $0x6] ss:$9 sm:$0xff] %v70_v8  ;;  %s280_s7 = sshll.u32 %s443_s3, 4  ;;  %s282_s10 = sshll.u32 %s499_s4, 4  ;;  %s281_s7 = int_to_ptr.vmem [resolvable:$true] %s280_s7  ;;  %s283_s10 = int_to_ptr.hbm [resolvable:$true] %s282_s10 }
  0x17   :  { %98 = vst [vmem:[#allocation1 + $0x7] ss:$9 sm:$0xff] %v71_v9 }
  0x1e   :  { %v99_v10 = vld [vmem:[#allocation1] sm:$0xff] }
  0x1f   :  { %301 = vmatmul.msk.bf16.vlgmr.msra.gmra.mxu0 %vm112_vm0, %v99_v10 }
  0x9c   :  { %v124_v12 = vpop.f32.mrf.mxu0 }
  0x9d   :  { %v131_v13 = vrot.slane %v124_v12, 2  ;;  %v132_v14 = vrot.slane %v124_v12, 4  ;;  %v144_v15 = vadd.f32 %v143_v11, %v124_v12  ;;  %v133_v16 = vrot.slane %v124_v12, 6 }
  0x9f   :  { %v145_v17 = vadd.f32 %v143_v11, %v131_v13  ;;  %v146_v18 = vadd.f32 %v143_v11, %v132_v14  ;;  %314 = vtanh.f32 %v144_v15  ;;  %v147_v19 = vadd.f32 %v143_v11, %v133_v16 }
  0xa1   :  { %316 = vtanh.f32 %v146_v18 }
  0xa2   :  { %318 = vtanh.f32 %v145_v17 }
  0xa3   :  { %320 = vtanh.f32 %v147_v19 }
  0xa4   :  { %v126_v21 = vpop.f32.mrf.mxu0 }
  0xa5   :  { %v315_v22 = vpop.eup %314  ;;  %v134_v23 = vrot.slane %v126_v21, 2  ;;  %v135_v24 = vrot.slane %v126_v21, 4  ;;  %v148_v25 = vadd.f32 %v143_v11, %v126_v21  ;;  %v136_v26 = vrot.slane %v126_v21, 6 }
  0xa6   :  { %v164_v27 = vmul.f32 %v315_v22, %v313_v20 }
  0xa7   :  { %v149_v28 = vadd.f32 %v143_v11, %v134_v23  ;;  %v150_v29 = vadd.f32 %v143_v11, %v135_v24  ;;  %322 = vtanh.f32 %v148_v25  ;;  %v317_v30 = vpop.eup %316  ;;  %v151_v34 = vadd.f32 %v143_v11, %v136_v26 }
  0xa8   :  { %v173_v31 = vsel %vm172_vm1, %v164_v27, 0.0  ;;  %v319_v32 = vpop.eup %318  ;;  %v166_v33 = vmul.f32 %v317_v30, %v313_v20 }
  0xa9   :  { %174 = vadd.xlane.f32.xlu0 %v173_v31  ;;  %324 = vtanh.f32 %v149_v28  ;;  %v321_v36 = vpop.eup %320  ;;  %v165_v37 = vmul.f32 %v319_v32, %v313_v20 }
  0xaa   :  { %326 = vtanh.f32 %v150_v29  ;;  %v179_v35 = vsel %vm172_vm1, %v166_v33, 0.0  ;;  %v167_v40 = vmul.f32 %v321_v36, %v313_v20 }
  0xab   :  { %180 = vadd.xlane.f32.xlu1 %v179_v35  ;;  %328 = vtanh.f32 %v151_v34  ;;  %v176_v42 = vsel %vm172_vm1, %v165_v37, 0.0 }
  0xac   :  { %v182_v45 = vsel %vm172_vm1, %v167_v40, 0.0 }
  0xad   :  { %v323_v38 = vpop.eup %322 }
  0xae   :  { %v168_v39 = vmul.f32 %v323_v38, %v313_v20 }
  0xaf   :  { %v325_v41 = vpop.eup %324 }
  0xb0   :  { %v185_v43 = vsel %vm172_vm1, %v168_v39, 0.0  ;;  %v327_v44 = vpop.eup %326  ;;  %v169_v48 = vmul.f32 %v325_v41, %v313_v20 }
  0xb1   :  { %177 = vadd.xlane.f32.xlu0 %v176_v42  ;;  %186 = vadd.xlane.f32.xlu2 %v185_v43  ;;  %v329_v46 = vpop.eup %328  ;;  %v170_v47 = vmul.f32 %v327_v44, %v313_v20 }
  0xb2   :  { %v171_v49 = vmul.f32 %v329_v46, %v313_v20  ;;  %v188_v51 = vsel %vm172_vm1, %v169_v48, 0.0 }
  0xb3   :  { %183 = vadd.xlane.f32.xlu1 %v182_v45  ;;  %v191_v50 = vsel %vm172_vm1, %v170_v47, 0.0 }
  0xb4   :  { %v194_v52 = vsel %vm172_vm1, %v171_v49, 0.0 }
  0xb9   :  { %192 = vadd.xlane.f32.xlu0 %v191_v50  ;;  %189 = vadd.xlane.f32.xlu2 %v188_v51 }
  0xbb   :  { %195 = vadd.xlane.f32.xlu1 %v194_v52 }
 0x11c   :  { %v175_v53 = vpop.xlane.xlu0 %174 }
 0x11d   :  { %v207_v59 = vperm.slane %v175_v53, %v206_v56 }
 0x11e   :  { %v181_v55 = vpop.xlane.xlu1 %180 }
 0x11f   :  { %v209_v61 = vperm.slane %v181_v55, %v206_v56 }
 0x124   :  { %v178_v57 = vpop.xlane.xlu0 %177  ;;  %v187_v58 = vpop.xlane.xlu2 %186 }
 0x125   :  { %v208_v60 = vperm.slane %v178_v57, %v206_v56  ;;  %v211_v3 = vperm.slane %v187_v58, %v206_v56 }
 0x126   :  { %v184_v63 = vpop.xlane.xlu1 %183 }
 0x127   :  { %v216_v62 = vsel %vm215_vm2, %v208_v60, %v207_v59  ;;  %v210_v0 = vperm.slane %v184_v63, %v206_v56 }
 0x128   :  { %v218_v1 = vsel %vm217_vm3, %v209_v61, %v216_v62 }
 0x129   :  { %v220_v2 = vsel %vm219_vm4, %v210_v0, %v218_v1 }
 0x12a   :  { %v222_v8 = vsel %vm221_vm5, %v211_v3, %v220_v2 }
 0x12c   :  { %v193_v4 = vpop.xlane.xlu0 %192  ;;  %v190_v5 = vpop.xlane.xlu2 %189 }
 0x12d   :  { %v213_v6 = vperm.slane %v193_v4, %v206_v56  ;;  %v212_v7 = vperm.slane %v190_v5, %v206_v56 }
 0x12e   :  { %v196_v9 = vpop.xlane.xlu1 %195 }
 0x12f   :  { %v224_v10 = vsel %vm223_vm6, %v212_v7, %v222_v8  ;;  %v214_v11 = vperm.slane %v196_v9, %v206_v56 }
 0x130   :  { %v226_v12 = vsel %vm225_vm7, %v213_v6, %v224_v10 }
 0x131   :  { %v228_v13 = vsel %vm227_vm8, %v214_v11, %v226_v12 }
 0x132   :  { %230 = vxpose.xlu2.b32.start.end [1/1] (short) (narrow) %v228_v13, 8 }
 0x1cb   :  { %v246_v14 = vpop.trf.xlu2 }
 0x1cc   :  { %v263_v15 = vsel %vm262_vm9, %v246_v14, -inf }
 0x1cd   :  { %264 = vmax.xlane.f32.xlu0 %v263_v15 }
 0x240   :  { %v265_v16 = vpop.xlane.xlu0 %264 }
 0x241   :  { %v266_v17 = vsub.f32 %v246_v14, %v265_v16 }
 0x243   :  { %v267_v18 = vmul.f32 1.442695, %v266_v17 }
 0x245   :  { %330 = vpow2.f32 %v267_v18 }
 0x24b   :  { %v331_v19 = vpop.eup %330 }
 0x24c   :  { %v269_v20 = vsel %vm262_vm9, %v331_v19, 0.0 }
 0x24d   :  { %270 = vadd.xlane.f32.xlu1 %v269_v20 }
 0x2c0   :  { %v271_v21 = vpop.xlane.xlu1 %270 }
 0x2c1   :  { %332 = vrcp.f32 %v271_v21 }
 0x2c7   :  { %v333_v22 = vpop.eup %332 }
 0x2c8   :  { %v273_v23 = vmul.f32 %v333_v22, %v331_v19 }
 0x2ca   :  { %274 = vst.msk [vmem:[#allocation8] sm:$0x3] %vm262_vm9, %v273_v23 }
 0x2cb   :  { %285 = dma.vmem_to_hbm [thread:$0]  %s281_s7, 32, %s283_s10, [#allocation4]  }
 0x2cc   :  { %434 = dma.done.wait [#allocation4], 32  }
 0x2cd   :  { %435 = vsyncadd [#allocation4], 4294967264 }
 0x2ce   :  { %290 = vsyncpa [#allocation3], 1 }
 0x2cf   :  { %291 = vsyncpa [#allocation6], 1 }
 0x2d0   :  { %292 = vsyncpa [#allocation4], 1 }

</bundles_post_ra>
